<compile_context>
chip_gen: v7x
topology: tpu7x:2x2x1
jax: 0.10.0
libtpu: 0.0.40
codegen_flags: <defaults>
</compile_context>

<pallas_src>
import math

import jax
import jax.numpy as jnp
from jax.experimental import pallas as pl
from jax.experimental.pallas import tpu as pltpu


def _round_up(x, m):
    return ((x + m - 1) // m) * m


def _pad2d(a, rows, cols):
    r, c = a.shape
    if r == rows and c == cols:
        return a
    return jnp.zeros((rows, cols), a.dtype).at[:r, :c].set(a)


# ---------------- generic tiled matmul kernels (accumulator pattern) ---------


def _mm_bias_kernel(a_ref, b_ref, bias_ref, o_ref, acc_ref):
    k = pl.program_id(1)

    @pl.when(k == 0)
    def _():
        acc_ref[...] = jnp.zeros_like(acc_ref)

    acc_ref[...] += jnp.dot(a_ref[...], b_ref[...],
                            preferred_element_type=jnp.float32)

    @pl.when(k == pl.num_programs(1) - 1)
    def _():
        o_ref[...] = (acc_ref[...] + bias_ref[...]).astype(o_ref.dtype)


def _mm_kernel(a_ref, b_ref, o_ref, acc_ref):
    k = pl.program_id(1)

    @pl.when(k == 0)
    def _():
        acc_ref[...] = jnp.zeros_like(acc_ref)

    acc_ref[...] += jnp.dot(a_ref[...], b_ref[...],
                            preferred_element_type=jnp.float32)

    @pl.when(k == pl.num_programs(1) - 1)
    def _():
        o_ref[...] = acc_ref[...].astype(o_ref.dtype)


def _tiled_matmul(a, b, bias=None, *, tm, tk):
    """C = A @ B (+ bias). A:[M,K], B:[K,Nf], bias:[1,Nf] or None.

    Caller guarantees: M % tm == 0, K % tk == 0, Nf % 128 == 0 (lane dense).
    Reduction over K runs as the innermost ("arbitrary") grid axis with a
    resident VMEM f32 accumulator; row tiles are "parallel".
    """
    m, kdim = a.shape
    _, nf = b.shape
    grid = (m // tm, kdim // tk)

    in_specs = [
        pl.BlockSpec((tm, tk), lambda i, k: (i, k)),   # A tile (streams from HBM)
        pl.BlockSpec((tk, nf), lambda i, k: (k, 0)),   # B tile (lane-dense)
    ]
    args = [a, b]
    if bias is not None:
        in_specs.append(pl.BlockSpec((1, nf), lambda i, k: (0, 0)))
        args.append(bias)
        kernel = _mm_bias_kernel
    else:
        kernel = _mm_kernel

    return pl.pallas_call(
        kernel,
        out_shape=jax.ShapeDtypeStruct((m, nf), a.dtype),
        grid_spec=pltpu.PrefetchScalarGridSpec(
            num_scalar_prefetch=0,
            grid=grid,
            in_specs=in_specs,
            out_specs=pl.BlockSpec((tm, nf), lambda i, k: (i, 0)),
            scratch_shapes=[pltpu.VMEM((tm, nf), jnp.float32)],
        ),
        compiler_params=pltpu.CompilerParams(
            dimension_semantics=("parallel", "arbitrary"),
        ),
    )(*args)


# ---------------- GCN layer wrapper ------------------------------------------


def graph_convolution(x, adj, weight, bias=None):
    """GCN layer: adj @ (x @ weight) + bias   (order swapped if F_out > F_in).

    x:      [N, F_in]  float32
    adj:    [N, N]     float32 dense adjacency (torch.spmm semantics)
    weight: [F_in, F_out]
    bias:   [F_out] or None
    returns [N, F_out]
    """
    n, f_in = x.shape
    f_out = weight.shape[1]
    assert adj.shape == (n, n)
    assert weight.shape == (f_in, f_out)
    dtype = x.dtype

    # Tile sizes for the N^2 adj matmul (128-aligned: MXU + lane density).
    tm = 256 if n >= 256 else _round_up(n, 128)   # adj row tile   (output rows)
    tk = 512 if n >= 512 else _round_up(n, 128)   # adj column tile (reduction)
    nr = _round_up(n, tm)                         # padded adj rows
    nc = _round_up(n, tk)                         # padded adj cols

    f_out_p = _round_up(f_out, 128)               # lane-dense output width

    adj_p = _pad2d(adj, nr, nc)                   # zero padding: no contribution

    bias_p = None
    if bias is not None:
        bias_p = jnp.zeros((1, f_out_p), dtype=dtype).at[0, :f_out].set(
            bias.astype(dtype))

    if f_out <= f_in:
        # order A: support = X @ W  (once), then out = adj @ support (+ bias)
        x_p = _pad2d(x, nc, f_in)                               # rows match adj cols
        w_p = _pad2d(weight.astype(dtype), f_in, f_out_p)
        support = _tiled_matmul(x_p, w_p, tm=tk, tk=f_in)       # [nc, f_out_p]
        out_p = _tiled_matmul(adj_p, support, bias_p, tm=tm, tk=tk)
    else:
        # order B: tmp = adj @ X, then out = tmp @ W (+ bias)
        f_in_p = _round_up(f_in, 128)
        x_p = _pad2d(x, nc, f_in_p)
        w_p = _pad2d(weight.astype(dtype), f_in_p, f_out_p)
        tmp = _tiled_matmul(adj_p, x_p, tm=tm, tk=tk)           # [nr, f_in_p]
        out_p = _tiled_matmul(tmp, w_p, bias_p, tm=tm, tk=f_in_p)

    return out_p[:n, :f_out]


# ---------------- self test ---------------------------------------------------


def _reference(x, adj, weight, bias):
    out = adj @ (x @ weight)
    return out if bias is None else out + bias[None, :]


if __name__ == "__main__":
    # Small GCN-ish shapes: N nodes, in_features -> out_features
    N, F_IN, F_OUT = 128, 64, 32

    key = jax.random.PRNGKey(0)
    kx, ka, kw, kb = jax.random.split(key, 4)

    # Node features
    x = jax.random.normal(kx, (N, F_IN), dtype=jnp.float32)

    # Row-normalized dense adjacency (self-loops + random edges), like pygcn.
    edges = (jax.random.uniform(ka, (N, N)) < 0.05).astype(jnp.float32)
    adj = edges + jnp.eye(N, dtype=jnp.float32)
    adj = adj / jnp.sum(adj, axis=1, keepdims=True)

    # Parameter init mirroring reset_parameters(): uniform(-stdv, stdv),
    # stdv = 1/sqrt(out_features).
    stdv = 1.0 / math.sqrt(F_OUT)
    weight = jax.random.uniform(kw, (F_IN, F_OUT), minval=-stdv, maxval=stdv,
                                dtype=jnp.float32)
    bias = jax.random.uniform(kb, (F_OUT,), minval=-stdv, maxval=stdv,
                              dtype=jnp.float32)

    # Main path (bias, F_out <= F_in → order A).
    out = jax.block_until_ready(graph_convolution(x, adj, weight, bias))
    assert out.shape == (N, F_OUT)
    assert jnp.allclose(out, _reference(x, adj, weight, bias),
                        atol=1e-4, rtol=1e-4), "mismatch vs reference (bias)"

    # No-bias path (no-bias kernel variant).
    out_nb = jax.block_until_ready(graph_convolution(x, adj, weight, None))
    assert jnp.allclose(out_nb, _reference(x, adj, weight, None),
                        atol=1e-4, rtol=1e-4), "mismatch vs reference (no bias)"

    # Wide-output layer (F_out > F_in → order B, (adj @ x) @ w).
    w_wide = jax.random.uniform(kw, (F_IN, 96), minval=-stdv, maxval=stdv,
                                dtype=jnp.float32)
    out_w = jax.block_until_ready(graph_convolution(x, adj, w_wide, None))
    assert jnp.allclose(out_w, _reference(x, adj, w_wide, None),
                        atol=1e-4, rtol=1e-4), "mismatch vs reference (wide)"

    print("KERNEL_OK")
</pallas_src>

<mosaic_0001>
module attributes {stable_mosaic.version = 11 : i64} {
  func.func @_mm_kernel(%arg0: i32, %arg1: i32, %arg2: memref<128x64xf32, #tpu.memory_space<vmem>>, %arg3: memref<64x128xf32, #tpu.memory_space<vmem>>, %arg4: memref<128x128xf32, #tpu.memory_space<vmem>>, %arg5: memref<128x128xf32, #tpu.memory_space<vmem>>) attributes {dimension_semantics = [#tpu.dimension_semantics<parallel>, #tpu.dimension_semantics<arbitrary>], iteration_bounds = array<i64: 1, 1>, scalar_prefetch = 0 : i64, scratch_operands = 1 : i64, tpu.core_type = #tpu.core_type<tc>, window_params = [{transform_indices = @transform_0, window_bounds = array<i64: 128, 64>}, {transform_indices = @transform_1, window_bounds = array<i64: 64, 128>}, {transform_indices = @transform_2, window_bounds = array<i64: 128, 128>}]} {
    %c0_i32 = arith.constant 0 : i32
    %0 = arith.cmpi eq, %arg1, %c0_i32 : i32
    %1 = arith.extui %0 : i1 to i32
    %c0_i32_0 = arith.constant 0 : i32
    %2 = arith.cmpi ne, %1, %c0_i32_0 : i32
    scf.if %2 {
      %cst_10 = arith.constant 0.000000e+00 : f32
      %12 = vector.broadcast %cst_10 : f32 to vector<128x128xf32>
      %c0_11 = arith.constant 0 : index
      %c0_12 = arith.constant 0 : index
      %13 = vector.load %arg5[%c0_11, %c0_12] : memref<128x128xf32, #tpu.memory_space<vmem>>, vector<128x128xf32>
      tpu.vector_store %arg5[%c0_11, %c0_12], %12 {strides = array<i32>} : memref<128x128xf32, #tpu.memory_space<vmem>>, vector<128x128xf32>,
    } else {
    }
    %c0 = arith.constant 0 : index
    %c0_1 = arith.constant 0 : index
    %3 = vector.load %arg5[%c0, %c0_1] : memref<128x128xf32, #tpu.memory_space<vmem>>, vector<128x128xf32>
    %c0_2 = arith.constant 0 : index
    %c0_3 = arith.constant 0 : index
    %4 = vector.load %arg2[%c0_2, %c0_3] : memref<128x64xf32, #tpu.memory_space<vmem>>, vector<128x64xf32>
    %c0_4 = arith.constant 0 : index
    %c0_5 = arith.constant 0 : index
    %5 = vector.load %arg3[%c0_4, %c0_5] : memref<64x128xf32, #tpu.memory_space<vmem>>, vector<64x128xf32>
    %cst = arith.constant dense<0.000000e+00> : vector<128x128xf32>
    %6 = tpu.matmul %4, %5, %cst {dimension_numbers = #tpu.dot_dimension_numbers<[1], [0], [0], [1], [0, 0, 1, 1], [], []>} : vector<128x64xf32>, vector<64x128xf32>, vector<128x128xf32> -> vector<128x128xf32>
    %7 = arith.addf %3, %6 : vector<128x128xf32>
    %c0_6 = arith.constant 0 : index
    %c0_7 = arith.constant 0 : index
    %8 = vector.load %arg5[%c0_6, %c0_7] : memref<128x128xf32, #tpu.memory_space<vmem>>, vector<128x128xf32>
    tpu.vector_store %arg5[%c0_6, %c0_7], %7 {strides = array<i32>} : memref<128x128xf32, #tpu.memory_space<vmem>>, vector<128x128xf32>,
    %c0_i32_8 = arith.constant 0 : i32
    %9 = arith.cmpi eq, %arg1, %c0_i32_8 : i32
    %10 = arith.extui %9 : i1 to i32
    %c0_i32_9 = arith.constant 0 : i32
    %11 = arith.cmpi ne, %10, %c0_i32_9 : i32
    scf.if %11 {
      %c0_10 = arith.constant 0 : index
      %c0_11 = arith.constant 0 : index
      %12 = vector.load %arg5[%c0_10, %c0_11] : memref<128x128xf32, #tpu.memory_space<vmem>>, vector<128x128xf32>
      %c0_12 = arith.constant 0 : index
      %c0_13 = arith.constant 0 : index
      %13 = vector.load %arg4[%c0_12, %c0_13] : memref<128x128xf32, #tpu.memory_space<vmem>>, vector<128x128xf32>
      tpu.vector_store %arg4[%c0_12, %c0_13], %12 {strides = array<i32>} : memref<128x128xf32, #tpu.memory_space<vmem>>, vector<128x128xf32>,
    } else {
    }
    return
  }
  func.func @transform_0(%arg0: i32, %arg1: i32) -> (i32, i32) {
    %c0_i32 = arith.constant 0 : i32
    return %arg0, %arg1 : i32, i32
  }
  func.func @transform_1(%arg0: i32, %arg1: i32) -> (i32, i32) {
    %c0_i32 = arith.constant 0 : i32
    %c0_i32_0 = arith.constant 0 : i32
    return %arg1, %c0_i32 : i32, i32
  }
  func.func @transform_2(%arg0: i32, %arg1: i32) -> (i32, i32) {
    %c0_i32 = arith.constant 0 : i32
    %c0_i32_0 = arith.constant 0 : i32
    return %arg0, %c0_i32 : i32, i32
  }
}

</mosaic_0001>

<bundles_post_ra>
// kernel: tpu_custom_call.1
= control target key start
LH: loop header
LB: loop body
LE: loop exit
PB: predicated region body
PF: predicated region fallthrough
CT: control target
= control target key end

     0   :  { %vm72_vm0 = vcmask 523264   ;;  %s598_s0 = inlined_call_operand.vmem [shape: f32[128,64], index: 0, kind: input, shape index: {}]   ;;  %s599_s1 = inlined_call_operand.vmem [shape: f32[64,128], index: 1, kind: input, shape index: {}]   ;;  %s600_s2 = inlined_call_operand.hbm [shape: f32[128,128], index: 2, kind: output, shape index: {}]  }
   0x1   :  { %v64_v0 = vld [vmem:[%s599_s1] sm:$0xff]  ;;  %v65_v1 = vld [vmem:[%s599_s1 + $0x8] sm:$0xff]  ;;  %v66_v2 = vld [vmem:[%s599_s1 + $0x10] sm:$0xff] }
   0x2   :  { %v429_v3 = vpack.c.bf16 %v65_v1, %v64_v0  ;;  %v67_v4 = vld [vmem:[%s599_s1 + $0x18] sm:$0xff]  ;;  %v68_v6 = vld [vmem:[%s599_s1 + $0x20] sm:$0xff]  ;;  %v69_v7 = vld [vmem:[%s599_s1 + $0x28] sm:$0xff] }
   0x3   :  { %v433_v5 = vpack.c.bf16 %v67_v4, %v66_v2  ;;  %v48_v8 = vld [vmem:[%s598_s0] sm:$0xff]  ;;  %v437_v10 = vpack.c.bf16 %v69_v7, %v68_v6  ;;  %v70_v11 = vld [vmem:[%s599_s1 + $0x30] sm:$0xff]  ;;  %v71_v12 = vld [vmem:[%s599_s1 + $0x38] sm:$0xff] }
   0x4   :  { %430 = vmatprep.subr.bf16.mxu0 %v429_v3  ;;  %445 = vmatprep.subr.bf16.mxu1 %v429_v3  ;;  %v56_v9 = vld [vmem:[%s598_s0 + $0x40] sm:$0xff] }
   0x5   :  { %432 = vmatpush3.bf16.msra.mxu0 %v429_v3  ;;  %449 = vmatpush3.bf16.msra.mxu1 %v429_v3 }
   0x6   :  { %434 = vmatprep.subr.bf16.mxu0 %v433_v5  ;;  %446 = vmatprep.subr.bf16.mxu1 %v433_v5 }
   0x7   :  { %405 = vmatprep.mubr.msk.f32.mxu0 %vm72_vm0, %v48_v8  ;;  %417 = vmatprep.mubr.msk.f32.mxu1 %vm72_vm0, %v56_v9 }
   0x9   :  { %436 = vmatpush3.bf16.msra.mxu0 %v433_v5  ;;  %450 = vmatpush3.bf16.msra.mxu1 %v433_v5 }
   0xa   :  { %7 = vsyncpa [#allocation4], 0  ;;  %438 = vmatprep.subr.bf16.mxu0 %v437_v10  ;;  %447 = vmatprep.subr.bf16.mxu1 %v437_v10  ;;  %v441_v13 = vpack.c.bf16 %v71_v12, %v70_v11  ;;  %v49_v14 = vld [vmem:[%s598_s0 + $0x8] sm:$0xff]  ;;  %v50_v16 = vld [vmem:[%s598_s0 + $0x10] sm:$0xff] }
   0xb   :  { %v57_v15 = vld [vmem:[%s598_s0 + $0x48] sm:$0xff]  ;;  %v58_v17 = vld [vmem:[%s598_s0 + $0x50] sm:$0xff]  ;;  %v51_v18 = vld [vmem:[%s598_s0 + $0x18] sm:$0xff] }
   0xc   :  { %v59_v19 = vld [vmem:[%s598_s0 + $0x58] sm:$0xff]  ;;  %v52_v20 = vld [vmem:[%s598_s0 + $0x20] sm:$0xff]  ;;  %v53_v22 = vld [vmem:[%s598_s0 + $0x28] sm:$0xff] }
   0xd   :  { %440 = vmatpush3.bf16.msra.mxu0 %v437_v10  ;;  %451 = vmatpush3.bf16.msra.mxu1 %v437_v10  ;;  %v60_v21 = vld [vmem:[%s598_s0 + $0x60] sm:$0xff]  ;;  %v61_v23 = vld [vmem:[%s598_s0 + $0x68] sm:$0xff]  ;;  %v54_v24 = vld [vmem:[%s598_s0 + $0x30] sm:$0xff] }
   0xe   :  { %442 = vmatprep.subr.bf16.mxu0 %v441_v13  ;;  %448 = vmatprep.subr.bf16.mxu1 %v441_v13  ;;  %v62_v25 = vld [vmem:[%s598_s0 + $0x70] sm:$0xff]  ;;  %v55_v26 = vld [vmem:[%s598_s0 + $0x38] sm:$0xff] }
   0xf   :  { %v63_v27 = vld [vmem:[%s598_s0 + $0x78] sm:$0xff]  ;;  %s480_s0 = smov [#allocation3]  }
  0x10   :  { %s338_s28 = sshll.u32 %s480_s0, 4  ;;  %s339_s28 = int_to_ptr.vmem [resolvable:$true] %s338_s28 }
  0x11   :  { %444 = vmatpush3.bf16.msra.mxu0 %v441_v13  ;;  %452 = vmatpush3.bf16.msra.mxu1 %v441_v13  ;;  %s456_s29 = scalar_lea.vmem %s339_s28, 2048  ;;  %p461_p1 = scmp.lt.s32.totalorder %s339_s28, %s339_s28 }
  0x12   :  { %p457_p0 = scmp.ne.s32.totalorder %s339_s28, %s456_s29  ;;  %p462_p2 = scmp.lt.s32.totalorder %s456_s29, %s456_s29 }
  0x14   :  { %406 = vmatmul.mubr.msk.f32.vlgmr.msra.gmra.mrb[0].mxu0 %vm72_vm0, %v49_v14  ;;  %418 = vmatmul.mubr.msk.f32.vlgmr.msra.gmra.mrb[0].mxu1 %vm72_vm0, %v57_v15  ;;  %p463_p3 = por %p462_p2, %p461_p1 }
  0x15   :  { %408 = vmatprep.mubr.msk.f32.mxu0 %vm72_vm0, %v50_v16  ;;  %420 = vmatprep.mubr.msk.f32.mxu1 %vm72_vm0, %v58_v17 }
  0x16   :  { %p464_p4 = pnand %p463_p3, %p457_p0 }
  0x18   :  { %409 = vmatmul.mubr.msk.f32.gmra.mrb[2].mxu0 %vm72_vm0, %v51_v18  ;;  %421 = vmatmul.mubr.msk.f32.gmra.mrb[2].mxu1 %vm72_vm0, %v59_v19 }
  0x19   :  { %411 = vmatprep.mubr.msk.f32.mxu0 %vm72_vm0, %v52_v20  ;;  %423 = vmatprep.mubr.msk.f32.mxu1 %vm72_vm0, %v60_v21 }
  0x1c   :  { %412 = vmatmul.mubr.msk.f32.gmra.mrb[4].mxu0 %vm72_vm0, %v53_v22  ;;  %424 = vmatmul.mubr.msk.f32.gmra.mrb[4].mxu1 %vm72_vm0, %v61_v23 }
  0x1d   :  { %414 = vmatprep.mubr.msk.f32.mxu0 %vm72_vm0, %v54_v24  ;;  %426 = vmatprep.mubr.msk.f32.mxu1 %vm72_vm0, %v62_v25 }
  0x20   :  { %415 = vmatmul.mubr.msk.f32.gmra.mrb[6].mxu0 %vm72_vm0, %v55_v26  ;;  %427 = vmatmul.mubr.msk.f32.gmra.mrb[6].mxu1 %vm72_vm0, %v63_v27 }
  0xe7   :  { %v407_v28 = vpop.f32.mrb[0].mxu0  ;;  %v419_v29 = vpop.f32.mrb[0].mxu1 }
  0xe8   :  { %318 = vst [vmem:[#allocation3 + $0x8] sm:$0xff] %v407_v28  ;;  %326 = vst [vmem:[#allocation3 + $0x48] sm:$0xff] %v419_v29  ;;  %v187_v30 = vpop.f32.mrb[1].mxu0  ;;  %v227_v31 = vpop.f32.mrb[1].mxu1 }
  0xe9   :  { %317 = vst [vmem:[#allocation3] sm:$0xff] %v187_v30  ;;  %325 = vst [vmem:[#allocation3 + $0x40] sm:$0xff] %v227_v31 }
  0xeb   :  { %v410_v32 = vpop.f32.mrb[2].mxu0  ;;  %v422_v33 = vpop.f32.mrb[2].mxu1 }
  0xec   :  { %320 = vst [vmem:[#allocation3 + $0x18] sm:$0xff] %v410_v32  ;;  %328 = vst [vmem:[#allocation3 + $0x58] sm:$0xff] %v422_v33  ;;  %v197_v34 = vpop.f32.mrb[3].mxu0  ;;  %v237_v35 = vpop.f32.mrb[3].mxu1 }
  0xed   :  { %319 = vst [vmem:[#allocation3 + $0x10] sm:$0xff] %v197_v34  ;;  %327 = vst [vmem:[#allocation3 + $0x50] sm:$0xff] %v237_v35 }
  0xef   :  { %v413_v36 = vpop.f32.mrb[4].mxu0  ;;  %v425_v37 = vpop.f32.mrb[4].mxu1 }
  0xf0   :  { %322 = vst [vmem:[#allocation3 + $0x28] sm:$0xff] %v413_v36  ;;  %330 = vst [vmem:[#allocation3 + $0x68] sm:$0xff] %v425_v37  ;;  %v207_v38 = vpop.f32.mrb[5].mxu0  ;;  %v247_v39 = vpop.f32.mrb[5].mxu1 }
  0xf1   :  { %321 = vst [vmem:[#allocation3 + $0x20] sm:$0xff] %v207_v38  ;;  %329 = vst [vmem:[#allocation3 + $0x60] sm:$0xff] %v247_v39 }
  0xf3   :  { %v416_v40 = vpop.f32.mrb[6].mxu0  ;;  %v428_v41 = vpop.f32.mrb[6].mxu1 }
  0xf4   :  { %324 = vst [vmem:[#allocation3 + $0x38] sm:$0xff] %v416_v40  ;;  %332 = vst [vmem:[#allocation3 + $0x78] sm:$0xff] %v428_v41  ;;  %v217_v42 = vpop.f32.mrb[7].mxu0  ;;  %v257_v43 = vpop.f32.mrb[7].mxu1 }
  0xf5   :  { %323 = vst [vmem:[#allocation3 + $0x30] sm:$0xff] %v217_v42  ;;  %331 = vst [vmem:[#allocation3 + $0x70] sm:$0xff] %v257_v43 }
  0xf6   :  { %467 = shalt.err (!%p464_p4)
}
  0xf7   :  { %s468_s3 = scalar_lea.hbm %s600_s2, 2048 }
  0xf8   :  { %p469_p5 = scmp.ne.s32.totalorder %s600_s2, %s468_s3  ;;  %p472_p6 = scmp.lt.u32.totalorder %s468_s3, %s600_s2 }
  0xfa   :  { %p474_p7 = pnand %p472_p6, %p469_p5 }
  0xfc   :  { %477 = shalt.err (!%p474_p7)
}
  0xfd   :  { %s481_s8 = smov 128   ;;  %s482_s9 = smov 8  }
  0xfe   :  { %344 = dma.vmem_to_hbm [thread:$0]  %s339_s28, 2048, %s600_s2, [#allocation4], %s481_s8, %s481_s8, %s482_s9  }
  0xff   :  { %478 = dma.done.wait [#allocation4], 2048  }
 0x100   :  { %479 = vsyncadd [#allocation4], 4294965248 }
 0x101   :  { %348 = vsyncpa [#allocation4], 1 }

</bundles_post_ra>
